<compile_context>
chip_gen: v7x
topology: tpu7x:2x2x1
jax: 0.10.0
libtpu: 0.0.40
codegen_flags: <defaults>
</compile_context>

<pallas_src>
import functools

import numpy as np
import jax
import jax.numpy as jnp
from jax.experimental import pallas as pl
from jax.experimental.pallas import tpu as pltpu


def gaussian_taps_1d(kernel: int) -> np.ndarray:
    """1-D taps of scipy.ndimage.gaussian_filter applied to a length-k delta
    (truncate=4.0, mode='reflect').  GaussianLayer.weights_init uses the 2-D
    filter of a k x k delta, which is exactly outer(taps, taps)."""
    sigma = 0.3 * ((kernel - 1) * 0.5 - 1) + 0.8
    radius = int(4.0 * sigma + 0.5)
    x = np.arange(-radius, radius + 1, dtype=np.float64)
    phi = np.exp(-0.5 * (x / sigma) ** 2)
    phi /= phi.sum()
    delta = np.zeros(kernel, dtype=np.float64)
    delta[kernel // 2] = 1.0
    # scipy's 'reflect' boundary == numpy 'symmetric'
    padded = np.pad(delta, radius, mode="symmetric")
    g1d = np.array(
        [np.dot(padded[i : i + 2 * radius + 1], phi) for i in range(kernel)]
    )
    return g1d


def _vmem_capacity_bytes() -> int:
    """Physical VMEM per core; conservative 64 MiB (v7x) fallback."""
    try:
        info = pltpu.get_tpu_info()
        for name in ("vmem_capacity_bytes", "vmem_size_bytes", "vmem_bytes"):
            cap = getattr(info, name, None)
            if cap:
                return int(cap)
    except Exception:
        pass
    return 64 * 1024 * 1024


def _choose_tiles(H, W, Wp8, Cp, k, budget_bytes):
    """Pick (band, c_tile) so each grid step fits the VMEM budget and the grid
    has enough steps for pipelining / both v7x TensorCores."""
    p = k // 2
    n128 = Cp // 128
    c_divs = [m for m in range(1, n128 + 1) if n128 % m == 0]
    h_divs = [b for b in range(1, H + 1) if H % b == 0]

    def step_bytes(band, c_mult):
        ct = 128 * c_mult
        in_blk = band * Wp8 * ct * 4          # double-buffered below
        halo_blk = 2 * p * Wp8 * ct * 4
        out_blk = band * W * ct * 4
        scratch = (band + 2 * p) * W * ct * 4
        live = 2 * (band + 2 * p) * W * ct * 4  # accumulators / loaded slices
        return 2 * (in_blk + halo_blk + out_blk) + scratch + live

    cands = []
    for cm in c_divs:
        for b in h_divs:
            if step_bytes(b, cm) > budget_bytes:
                continue
            steps = (n128 // cm) * (H // b)
            cands.append((steps, -b, -cm))
    if not cands:
        raise ValueError(
            "GaussianLayer Pallas kernel: no (band, channel-tile) configuration "
            "fits the VMEM budget; spatial size too large for this kernel."
        )
    max_steps = max(c[0] for c in cands)
    target = min(4, max_steps)                 # >=4 pipeline steps when possible
    good = sorted(c for c in cands if c[0] >= target)
    _, neg_b, neg_cm = good[0]                 # fewest steps >= target = biggest blocks
    return -neg_b, 128 * (-neg_cm)


def _make_kernel(band, W, Wp8, k, taps):
    """Separable depthwise Gaussian on a channels-last H-band with halo rows."""
    p = k // 2
    taps = tuple(float(t) for t in taps)       # compile-time constants

    def kernel_fn(halo_ref, x_ref, o_ref, h_buf):
        # halo_ref: (2p,   Wp8, Ct)  p reflected rows above the band, then p below
        # x_ref   : (band, Wp8, Ct)  band rows, W already reflect-padded, C on lanes
        # o_ref   : (band, W,   Ct)  output block (lane-dense stores)
        # h_buf   : (band+2p, W, Ct) f32 scratch: horizontal-pass result

        def hpass(ref):
            # Horizontal k-tap pass straight from the ref: per-tap shifted loads,
            # cast per slice; no input copy, no materialized shifted value slices.
            acc = ref[:, 0:W, :].astype(jnp.float32) * taps[0]
            for j in range(1, k):
                acc = acc + ref[:, j : j + W, :].astype(jnp.float32) * taps[j]
            return acc

        h_halo = hpass(halo_ref)                       # (2p, W, Ct)
        h_buf[0:p, :, :] = h_halo[0:p]                 # rows above the band
        h_buf[p + band : band + 2 * p, :, :] = h_halo[p : 2 * p]  # rows below
        h_buf[p : p + band, :, :] = hpass(x_ref)       # the band itself

        # Vertical k-tap pass: per-tap major-axis slices of the scratch ref
        # (whole vreg-plane selects, no intra-vreg data movement).
        out = h_buf[0:band, :, :] * taps[0]
        for j in range(1, k):
            out = out + h_buf[j : j + band, :, :] * taps[j]

        o_ref[...] = out.astype(o_ref.dtype)           # single cast, full-lane store

    return kernel_fn


@functools.partial(jax.jit, static_argnames=("kernel",))
def gaussian_layer(x: jax.Array, kernel: int) -> jax.Array:
    """Forward pass of GaussianLayer: ReflectionPad2d(k//2) + depthwise Gaussian conv."""
    B, C, H, W = x.shape
    k = int(kernel)
    # TODO(synk): even kernel sizes change the output spatial size in the torch
    # module (ReflectionPad2d(k//2) + valid conv); only odd k is supported here.
    assert k % 2 == 1 and k >= 3, "odd kernel size >= 3 required"
    p = k // 2
    assert H > p and W > p, "reflection padding requires H, W > kernel // 2"

    taps = gaussian_taps_1d(k)

    BC = B * C
    Cp = ((BC + 127) // 128) * 128       # lane padding; throughput scales as BC/Cp
    Wp = W + 2 * p
    Wp8 = ((Wp + 7) // 8) * 8            # sublane-aligned padded width

    # ---- VMEM budget derived from the chip (v5e/v6e 128 MiB, v7x 64 MiB) ----
    vmem_cap = _vmem_capacity_bytes()
    vmem_limit = int(min(vmem_cap * 9 // 10, vmem_cap - (2 << 20)))
    budget = vmem_limit * 3 // 5

    band, c_tile = _choose_tiles(H, W, Wp8, Cp, k, budget)
    n_bands = H // band
    n_c = Cp // c_tile

    # ---- layout plumbing: (B,C,H,W) -> (H, Wp8, Cp), channels-last ----------
    # W reflection, the pad to Wp8 and the channel zero-pad are folded around
    # the single layout-change transpose the wrapper needs anyway.
    x_r = x.reshape(BC, H, W)
    x_r = jnp.pad(x_r, ((0, 0), (0, 0), (p, p)), mode="reflect")       # (BC,H,Wp)
    x_t = jnp.transpose(x_r, (1, 2, 0))                                # (H,Wp,BC)
    x_t = jnp.pad(x_t, ((0, 0), (0, Wp8 - Wp), (0, Cp - BC)))          # (H,Wp8,Cp)

    # ---- small per-band halo: p reflected rows above + p below each band ----
    rel = np.concatenate([np.arange(-p, 0), np.arange(band, band + p)])
    h_idx = np.arange(n_bands)[:, None] * band + rel[None, :]          # (n_bands, 2p)
    h_idx = np.where(h_idx < 0, -h_idx, h_idx)
    h_idx = np.where(h_idx >= H, 2 * H - 2 - h_idx, h_idx)
    halo = jnp.take(x_t, jnp.asarray(h_idx.reshape(-1), jnp.int32), axis=0)
    halo = halo.reshape(n_bands, 2 * p, Wp8, Cp)

    out_t = pl.pallas_call(
        _make_kernel(band, W, Wp8, k, taps),
        out_shape=jax.ShapeDtypeStruct((H, W, Cp), x.dtype),
        grid=(n_c, n_bands),
        in_specs=[
            pl.BlockSpec((None, 2 * p, Wp8, c_tile), lambda c, h: (h, 0, 0, c)),
            pl.BlockSpec((band, Wp8, c_tile), lambda c, h: (h, 0, c)),
        ],
        out_specs=pl.BlockSpec((band, W, c_tile), lambda c, h: (h, 0, c)),
        scratch_shapes=[pltpu.VMEM((band + 2 * p, W, c_tile), jnp.float32)],
        compiler_params=pltpu.CompilerParams(
            dimension_semantics=("parallel", "parallel"),
            vmem_limit_bytes=int(vmem_limit),
        ),
    )(halo, x_t)

    out = jnp.transpose(out_t[:, :, :BC], (2, 0, 1)).reshape(B, C, H, W)
    return out


def _reference(x, kernel):
    """Pure-JAX reference (full k x k taps, no Pallas) for correctness check."""
    B, C, H, W = x.shape
    k = kernel
    p = k // 2
    g = gaussian_taps_1d(k)
    w2d = jnp.asarray(np.outer(g, g), jnp.float32)
    x_pad = jnp.pad(x, ((0, 0), (0, 0), (p, p), (p, p)), mode="reflect")
    acc = jnp.zeros((B, C, H, W), jnp.float32)
    for dh in range(k):
        for dw in range(k):
            acc = acc + x_pad[:, :, dh : dh + H, dw : dw + W] * w2d[dh, dw]
    return acc.astype(x.dtype)


if __name__ == "__main__":
    # Small, deterministic example consistent with the module's forward:
    # x is B x N x H x W where N = num_keypoints (4 here for speed).
    num_keypoints = 4
    kernel = 5
    B, H, W = 2, 16, 16

    key = jax.random.PRNGKey(0)
    x = jax.random.normal(key, (B, num_keypoints, H, W), dtype=jnp.float32)

    y = gaussian_layer(x, kernel=kernel)
    y = jax.block_until_ready(y)

    y_ref = _reference(x, kernel)
    assert y.shape == (B, num_keypoints, H, W)
    max_err = float(jnp.max(jnp.abs(y - y_ref)))
    assert jnp.allclose(y, y_ref, atol=2e-5, rtol=2e-5), max_err

    print("KERNEL_OK")
</pallas_src>

<mosaic_0001>
module attributes {stable_mosaic.version = 11 : i64} {
  func.func @kernel_fn(%arg0: i32, %arg1: i32, %arg2: memref<1x4x24x128xf32, #tpu.memory_space<vmem>>, %arg3: memref<4x24x128xf32, #tpu.memory_space<vmem>>, %arg4: memref<4x16x128xf32, #tpu.memory_space<vmem>>, %arg5: memref<8x16x128xf32, #tpu.memory_space<vmem>>) attributes {dimension_semantics = [#tpu.dimension_semantics<parallel>, #tpu.dimension_semantics<parallel>], iteration_bounds = array<i64: 1, 4>, scalar_prefetch = 0 : i64, scratch_operands = 1 : i64, tpu.core_type = #tpu.core_type<tc>, window_params = [{transform_indices = @transform_0, window_bounds = array<i64: 1, 4, 24, 128>}, {transform_indices = @transform_1, window_bounds = array<i64: 4, 24, 128>}, {transform_indices = @transform_2, window_bounds = array<i64: 4, 16, 128>}]} {
    %c0 = arith.constant 0 : index
    %c0_0 = arith.constant 0 : index
    %c0_1 = arith.constant 0 : index
    %c0_2 = arith.constant 0 : index
    %0 = vector.load %arg2[%c0, %c0_0, %c0_1, %c0_2] : memref<1x4x24x128xf32, #tpu.memory_space<vmem>>, vector<1x4x16x128xf32>
    %1 = vector.shape_cast %0 : vector<1x4x16x128xf32> to vector<4x16x128xf32>
    %cst = arith.constant 0.0782501251 : f32
    %2 = vector.broadcast %cst : f32 to vector<4x16x128xf32>
    %3 = arith.mulf %1, %2 : vector<4x16x128xf32>
    %c0_3 = arith.constant 0 : index
    %c0_4 = arith.constant 0 : index
    %c1 = arith.constant 1 : index
    %c0_5 = arith.constant 0 : index
    %4 = vector.load %arg2[%c0_3, %c0_4, %c1, %c0_5] : memref<1x4x24x128xf32, #tpu.memory_space<vmem>>, vector<1x4x16x128xf32>
    %5 = vector.shape_cast %4 : vector<1x4x16x128xf32> to vector<4x16x128xf32>
    %cst_6 = arith.constant 0.240408137 : f32
    %6 = vector.broadcast %cst_6 : f32 to vector<4x16x128xf32>
    %7 = arith.mulf %5, %6 : vector<4x16x128xf32>
    %8 = arith.addf %3, %7 : vector<4x16x128xf32>
    %c0_7 = arith.constant 0 : index
    %c0_8 = arith.constant 0 : index
    %c2 = arith.constant 2 : index
    %c0_9 = arith.constant 0 : index
    %9 = vector.load %arg2[%c0_7, %c0_8, %c2, %c0_9] : memref<1x4x24x128xf32, #tpu.memory_space<vmem>>, vector<1x4x16x128xf32>
    %10 = vector.shape_cast %9 : vector<1x4x16x128xf32> to vector<4x16x128xf32>
    %cst_10 = arith.constant 0.362683475 : f32
    %11 = vector.broadcast %cst_10 : f32 to vector<4x16x128xf32>
    %12 = arith.mulf %10, %11 : vector<4x16x128xf32>
    %13 = arith.addf %8, %12 : vector<4x16x128xf32>
    %c0_11 = arith.constant 0 : index
    %c0_12 = arith.constant 0 : index
    %c3 = arith.constant 3 : index
    %c0_13 = arith.constant 0 : index
    %14 = vector.load %arg2[%c0_11, %c0_12, %c3, %c0_13] : memref<1x4x24x128xf32, #tpu.memory_space<vmem>>, vector<1x4x16x128xf32>
    %15 = vector.shape_cast %14 : vector<1x4x16x128xf32> to vector<4x16x128xf32>
    %cst_14 = arith.constant 0.240408137 : f32
    %16 = vector.broadcast %cst_14 : f32 to vector<4x16x128xf32>
    %17 = arith.mulf %15, %16 : vector<4x16x128xf32>
    %18 = arith.addf %13, %17 : vector<4x16x128xf32>
    %c0_15 = arith.constant 0 : index
    %c0_16 = arith.constant 0 : index
    %c4 = arith.constant 4 : index
    %c0_17 = arith.constant 0 : index
    %19 = vector.load %arg2[%c0_15, %c0_16, %c4, %c0_17] : memref<1x4x24x128xf32, #tpu.memory_space<vmem>>, vector<1x4x16x128xf32>
    %20 = vector.shape_cast %19 : vector<1x4x16x128xf32> to vector<4x16x128xf32>
    %cst_18 = arith.constant 0.0782501251 : f32
    %21 = vector.broadcast %cst_18 : f32 to vector<4x16x128xf32>
    %22 = arith.mulf %20, %21 : vector<4x16x128xf32>
    %23 = arith.addf %18, %22 : vector<4x16x128xf32>
    %24 = vector.extract_strided_slice %23 {offsets = [0, 0, 0], sizes = [2, 16, 128], strides = [1, 1, 1]} : vector<4x16x128xf32> to vector<2x16x128xf32>
    %c0_19 = arith.constant 0 : index
    %c0_20 = arith.constant 0 : index
    %c0_21 = arith.constant 0 : index
    %25 = vector.load %arg5[%c0_19, %c0_20, %c0_21] : memref<8x16x128xf32, #tpu.memory_space<vmem>>, vector<2x16x128xf32>
    tpu.vector_store %arg5[%c0_19, %c0_20, %c0_21], %24 {strides = array<i32>} : memref<8x16x128xf32, #tpu.memory_space<vmem>>, vector<2x16x128xf32>,
    %26 = vector.extract_strided_slice %23 {offsets = [2, 0, 0], sizes = [2, 16, 128], strides = [1, 1, 1]} : vector<4x16x128xf32> to vector<2x16x128xf32>
    %c6 = arith.constant 6 : index
    %c0_22 = arith.constant 0 : index
    %c0_23 = arith.constant 0 : index
    %27 = vector.load %arg5[%c6, %c0_22, %c0_23] : memref<8x16x128xf32, #tpu.memory_space<vmem>>, vector<2x16x128xf32>
    tpu.vector_store %arg5[%c6, %c0_22, %c0_23], %26 {strides = array<i32>} : memref<8x16x128xf32, #tpu.memory_space<vmem>>, vector<2x16x128xf32>,
    %c0_24 = arith.constant 0 : index
    %c0_25 = arith.constant 0 : index
    %c0_26 = arith.constant 0 : index
    %28 = vector.load %arg3[%c0_24, %c0_25, %c0_26] : memref<4x24x128xf32, #tpu.memory_space<vmem>>, vector<4x16x128xf32>
    %cst_27 = arith.constant 0.0782501251 : f32
    %29 = vector.broadcast %cst_27 : f32 to vector<4x16x128xf32>
    %30 = arith.mulf %28, %29 : vector<4x16x128xf32>
    %c0_28 = arith.constant 0 : index
    %c1_29 = arith.constant 1 : index
    %c0_30 = arith.constant 0 : index
    %31 = vector.load %arg3[%c0_28, %c1_29, %c0_30] : memref<4x24x128xf32, #tpu.memory_space<vmem>>, vector<4x16x128xf32>
    %cst_31 = arith.constant 0.240408137 : f32
    %32 = vector.broadcast %cst_31 : f32 to vector<4x16x128xf32>
    %33 = arith.mulf %31, %32 : vector<4x16x128xf32>
    %34 = arith.addf %30, %33 : vector<4x16x128xf32>
    %c0_32 = arith.constant 0 : index
    %c2_33 = arith.constant 2 : index
    %c0_34 = arith.constant 0 : index
    %35 = vector.load %arg3[%c0_32, %c2_33, %c0_34] : memref<4x24x128xf32, #tpu.memory_space<vmem>>, vector<4x16x128xf32>
    %cst_35 = arith.constant 0.362683475 : f32
    %36 = vector.broadcast %cst_35 : f32 to vector<4x16x128xf32>
    %37 = arith.mulf %35, %36 : vector<4x16x128xf32>
    %38 = arith.addf %34, %37 : vector<4x16x128xf32>
    %c0_36 = arith.constant 0 : index
    %c3_37 = arith.constant 3 : index
    %c0_38 = arith.constant 0 : index
    %39 = vector.load %arg3[%c0_36, %c3_37, %c0_38] : memref<4x24x128xf32, #tpu.memory_space<vmem>>, vector<4x16x128xf32>
    %cst_39 = arith.constant 0.240408137 : f32
    %40 = vector.broadcast %cst_39 : f32 to vector<4x16x128xf32>
    %41 = arith.mulf %39, %40 : vector<4x16x128xf32>
    %42 = arith.addf %38, %41 : vector<4x16x128xf32>
    %c0_40 = arith.constant 0 : index
    %c4_41 = arith.constant 4 : index
    %c0_42 = arith.constant 0 : index
    %43 = vector.load %arg3[%c0_40, %c4_41, %c0_42] : memref<4x24x128xf32, #tpu.memory_space<vmem>>, vector<4x16x128xf32>
    %cst_43 = arith.constant 0.0782501251 : f32
    %44 = vector.broadcast %cst_43 : f32 to vector<4x16x128xf32>
    %45 = arith.mulf %43, %44 : vector<4x16x128xf32>
    %46 = arith.addf %42, %45 : vector<4x16x128xf32>
    %c2_44 = arith.constant 2 : index
    %c0_45 = arith.constant 0 : index
    %c0_46 = arith.constant 0 : index
    %47 = vector.load %arg5[%c2_44, %c0_45, %c0_46] : memref<8x16x128xf32, #tpu.memory_space<vmem>>, vector<4x16x128xf32>
    tpu.vector_store %arg5[%c2_44, %c0_45, %c0_46], %46 {strides = array<i32>} : memref<8x16x128xf32, #tpu.memory_space<vmem>>, vector<4x16x128xf32>,
    %c0_47 = arith.constant 0 : index
    %c0_48 = arith.constant 0 : index
    %c0_49 = arith.constant 0 : index
    %48 = vector.load %arg5[%c0_47, %c0_48, %c0_49] : memref<8x16x128xf32, #tpu.memory_space<vmem>>, vector<4x16x128xf32>
    %cst_50 = arith.constant 0.0782501251 : f32
    %49 = vector.broadcast %cst_50 : f32 to vector<4x16x128xf32>
    %50 = arith.mulf %48, %49 : vector<4x16x128xf32>
    %c1_51 = arith.constant 1 : index
    %c0_52 = arith.constant 0 : index
    %c0_53 = arith.constant 0 : index
    %51 = vector.load %arg5[%c1_51, %c0_52, %c0_53] : memref<8x16x128xf32, #tpu.memory_space<vmem>>, vector<4x16x128xf32>
    %cst_54 = arith.constant 0.240408137 : f32
    %52 = vector.broadcast %cst_54 : f32 to vector<4x16x128xf32>
    %53 = arith.mulf %51, %52 : vector<4x16x128xf32>
    %54 = arith.addf %50, %53 : vector<4x16x128xf32>
    %c2_55 = arith.constant 2 : index
    %c0_56 = arith.constant 0 : index
    %c0_57 = arith.constant 0 : index
    %55 = vector.load %arg5[%c2_55, %c0_56, %c0_57] : memref<8x16x128xf32, #tpu.memory_space<vmem>>, vector<4x16x128xf32>
    %cst_58 = arith.constant 0.362683475 : f32
    %56 = vector.broadcast %cst_58 : f32 to vector<4x16x128xf32>
    %57 = arith.mulf %55, %56 : vector<4x16x128xf32>
    %58 = arith.addf %54, %57 : vector<4x16x128xf32>
    %c3_59 = arith.constant 3 : index
    %c0_60 = arith.constant 0 : index
    %c0_61 = arith.constant 0 : index
    %59 = vector.load %arg5[%c3_59, %c0_60, %c0_61] : memref<8x16x128xf32, #tpu.memory_space<vmem>>, vector<4x16x128xf32>
    %cst_62 = arith.constant 0.240408137 : f32
    %60 = vector.broadcast %cst_62 : f32 to vector<4x16x128xf32>
    %61 = arith.mulf %59, %60 : vector<4x16x128xf32>
    %62 = arith.addf %58, %61 : vector<4x16x128xf32>
    %c4_63 = arith.constant 4 : index
    %c0_64 = arith.constant 0 : index
    %c0_65 = arith.constant 0 : index
    %63 = vector.load %arg5[%c4_63, %c0_64, %c0_65] : memref<8x16x128xf32, #tpu.memory_space<vmem>>, vector<4x16x128xf32>
    %cst_66 = arith.constant 0.0782501251 : f32
    %64 = vector.broadcast %cst_66 : f32 to vector<4x16x128xf32>
    %65 = arith.mulf %63, %64 : vector<4x16x128xf32>
    %66 = arith.addf %62, %65 : vector<4x16x128xf32>
    %c0_67 = arith.constant 0 : index
    %c0_68 = arith.constant 0 : index
    %c0_69 = arith.constant 0 : index
    %67 = vector.load %arg4[%c0_67, %c0_68, %c0_69] : memref<4x16x128xf32, #tpu.memory_space<vmem>>, vector<4x16x128xf32>
    tpu.vector_store %arg4[%c0_67, %c0_68, %c0_69], %66 {strides = array<i32>} : memref<4x16x128xf32, #tpu.memory_space<vmem>>, vector<4x16x128xf32>,
    return
  }
  func.func @transform_0(%arg0: i32, %arg1: i32) -> (i32, i32, i32, i32) {
    %c0_i32 = arith.constant 0 : i32
    %c0_i32_0 = arith.constant 0 : i32
    %c0_i32_1 = arith.constant 0 : i32
    return %arg1, %c0_i32, %c0_i32_0, %arg0 : i32, i32, i32, i32
  }
  func.func @transform_1(%arg0: i32, %arg1: i32) -> (i32, i32, i32) {
    %c0_i32 = arith.constant 0 : i32
    %c0_i32_0 = arith.constant 0 : i32
    return %arg1, %c0_i32, %arg0 : i32, i32, i32
  }
  func.func @transform_2(%arg0: i32, %arg1: i32) -> (i32, i32, i32) {
    %c0_i32 = arith.constant 0 : i32
    %c0_i32_0 = arith.constant 0 : i32
    return %arg1, %c0_i32, %arg0 : i32, i32, i32
  }
}

</mosaic_0001>

<bundles_post_ra>
// kernel: gaussian_layer.1
= control target key start
LH: loop header
LB: loop body
LE: loop exit
PB: predicated region body
PF: predicated region fallthrough
CT: control target
= control target key end

     0   :  { %s763_s9 = smov 0   ;;  %s765_s10 = smov 0   ;;  %s958_s0 = inlined_call_operand.vmem [shape: f32[4,4,24,128], index: 0, kind: input, shape index: {}]   ;;  %s959_s1 = inlined_call_operand.vmem [shape: f32[16,24,128], index: 1, kind: input, shape index: {}]   ;;  %s960_s2 = inlined_call_operand.vmem [shape: f32[16,16,128], index: 2, kind: output, shape index: {}]  }
   0x1   :  { %s767_s11 = smov 0  }
   0x2 LB: > { %s21_s12 = sadd.s32 1, %s742_s10  ;;  %p688_p0 = scmp.ge.s32.totalorder %s746_s11, 1  ;;  %s746_s11 = sphi %s767_s11, %s12_s11   ;;  %s742_s10 = sphi %s765_s10, %s962_s10   ;;  %s738_s9 = sphi %s763_s9, %s961_s9  }
   0x3   : > { %p22_p1 = scmp.ge.s32.totalorder %s21_s12, 4  ;;  %p148_p2 = scmp.lt.s32.totalorder %s746_s11, 5 }
   0x5   : > { %s964_s12 = smov (%p22_p1, %s21_s12), 0  ;;  %p149_p3 = pnand %p688_p0, %p148_p2 }
   0x6   : > { %p186_p4 = scmp.lt.s32.totalorder (!%p149_p3), %s738_s9, 3  ;;  %s690_s13 = sshll.u32 (!%p149_p3), %s738_s9, 2 }
   0x7   : > { %152 = sbr.rel (%p149_p3) target bundleno = 86 (0x56), region = 28  ;;  %p195_p5 = scmp.lt.s32.totalorder (!%p149_p3), %s690_s13, 15 }
   0xe   : > { %s966_s9 = smov (!%p186_p4, %s738_s9), 3  ;;  %s968_s13 = smov (!%p195_p5, %s690_s13), 15 }
   0xf   : > { %s698_s14 = smul.u32 96, %s966_s9  ;;  %s697_s22 = sshll.u32 %s968_s13, 4 }
  0x10   : > { %s699_s15 = smul.u32 24, %s968_s13  ;;  %s854_s25 = scalar_lea.vmem %s960_s2, %s697_s22 }
  0x11   : > { %s787_s18 = scalar_lea.vmem %s958_s0, %s698_s14 }
  0x12   : > { %v214_v0 = vld [vmem:[%s787_s18] sm:$0xff]  ;;  %v216_v1 = vld [vmem:[%s787_s18 + $0x18] sm:$0xff]  ;;  %s795_s21 = scalar_lea.vmem %s959_s1, %s699_s15 }
  0x13   : > { %v230_v2 = vld [vmem:[%s787_s18 + $0x1] sm:$0xff]  ;;  %v222_v3 = vmul.f32 0.078250125, %v214_v0  ;;  %v224_v4 = vmul.f32 0.078250125, %v216_v1  ;;  %v232_v5 = vld [vmem:[%s787_s18 + $0x19] sm:$0xff] }
  0x14   : > { %v254_v6 = vld [vmem:[%s787_s18 + $0x2] sm:$0xff]  ;;  %v238_v7 = vmul.f32 0.24040814, %v230_v2  ;;  %v240_v8 = vmul.f32 0.24040814, %v232_v5  ;;  %v256_v9 = vld [vmem:[%s787_s18 + $0x1a] sm:$0xff] }
  0x15   : > { %v278_v10 = vld [vmem:[%s787_s18 + $0x3] sm:$0xff]  ;;  %v262_v11 = vmul.f32 0.36268348, %v254_v6  ;;  %v264_v12 = vmul.f32 0.36268348, %v256_v9  ;;  %v280_v13 = vld [vmem:[%s787_s18 + $0x1b] sm:$0xff] }
  0x16   : > { %v302_v14 = vld [vmem:[%s787_s18 + $0x4] sm:$0xff]  ;;  %v246_v15 = vadd.f32 %v238_v7, %v222_v3  ;;  %v248_v16 = vadd.f32 %v240_v8, %v224_v4  ;;  %v286_v17 = vmul.f32 0.24040814, %v278_v10  ;;  %v288_v18 = vmul.f32 0.24040814, %v280_v13  ;;  %v304_v19 = vld [vmem:[%s787_s18 + $0x1c] sm:$0xff] }
  0x17   : > { %v335_v20 = vld [vmem:[%s795_s21] sm:$0xff]  ;;  %v310_v21 = vmul.f32 0.078250125, %v302_v14  ;;  %v312_v22 = vmul.f32 0.078250125, %v304_v19  ;;  %v337_v23 = vld [vmem:[%s795_s21 + $0x18] sm:$0xff] }
  0x18   : > { %v339_v24 = vld [vmem:[%s795_s21 + $0x30] sm:$0xff]  ;;  %v270_v25 = vadd.f32 %v262_v11, %v246_v15  ;;  %v272_v26 = vadd.f32 %v264_v12, %v248_v16  ;;  %v343_v27 = vmul.f32 0.078250125, %v335_v20  ;;  %v345_v28 = vmul.f32 0.078250125, %v337_v23  ;;  %v351_v29 = vld [vmem:[%s795_s21 + $0x1] sm:$0xff] }
  0x19   : > { %v353_v30 = vld [vmem:[%s795_s21 + $0x19] sm:$0xff]  ;;  %v347_v31 = vmul.f32 0.078250125, %v339_v24  ;;  %v355_v32 = vld [vmem:[%s795_s21 + $0x31] sm:$0xff]  ;;  %v359_v33 = vmul.f32 0.24040814, %v351_v29 }
  0x1a   : > { %v375_v34 = vld [vmem:[%s795_s21 + $0x2] sm:$0xff]  ;;  %v294_v35 = vadd.f32 %v286_v17, %v270_v25  ;;  %v296_v36 = vadd.f32 %v288_v18, %v272_v26  ;;  %v361_v37 = vmul.f32 0.24040814, %v353_v30  ;;  %v363_v38 = vmul.f32 0.24040814, %v355_v32  ;;  %v377_v39 = vld [vmem:[%s795_s21 + $0x1a] sm:$0xff] }
  0x1b   : > { %v379_v40 = vld [vmem:[%s795_s21 + $0x32] sm:$0xff]  ;;  %v367_v41 = vadd.f32 %v359_v33, %v343_v27  ;;  %v383_v42 = vmul.f32 0.36268348, %v375_v34  ;;  %v385_v43 = vmul.f32 0.36268348, %v377_v39  ;;  %v399_v49 = vld [vmem:[%s795_s21 + $0x3] sm:$0xff] }
  0x1c   : > { %v387_v44 = vmul.f32 0.36268348, %v379_v40  ;;  %v318_v45 = vadd.f32 %v310_v21, %v294_v35  ;;  %v813_v46 = vadd.f32 %v312_v22, %v296_v36  ;;  %v369_v47 = vadd.f32 %v361_v37, %v345_v28  ;;  %v401_v50 = vld [vmem:[%s795_s21 + $0x1b] sm:$0xff]  ;;  %v403_v51 = vld [vmem:[%s795_s21 + $0x33] sm:$0xff]  ;;  %v423_v58 = vld [vmem:[%s795_s21 + $0x4] sm:$0xff] }
  0x1d   : > { %v371_v48 = vadd.f32 %v363_v38, %v347_v31  ;;  %v391_v52 = vadd.f32 %v383_v42, %v367_v41  ;;  %v407_v53 = vmul.f32 0.24040814, %v399_v49  ;;  %v409_v54 = vmul.f32 0.24040814, %v401_v50  ;;  %v425_v59 = vld [vmem:[%s795_s21 + $0x1c] sm:$0xff]  ;;  %v427_v60 = vld [vmem:[%s795_s21 + $0x34] sm:$0xff] }
  0x1e   : > { %v411_v55 = vmul.f32 0.24040814, %v403_v51  ;;  %v393_v56 = vadd.f32 %v385_v43, %v369_v47  ;;  %v464_v61 = vmul.f32 0.078250125, %v318_v45  ;;  %v431_v63 = vmul.f32 0.078250125, %v423_v58 }
  0x1f   : > { %v395_v57 = vadd.f32 %v387_v44, %v371_v48  ;;  %v415_v62 = vadd.f32 %v407_v53, %v391_v52  ;;  %v433_v0 = vmul.f32 0.078250125, %v425_v59  ;;  %v435_v1 = vmul.f32 0.078250125, %v427_v60  ;;  %v215_v5 = vld [vmem:[%s787_s18 + $0x8] sm:$0xff]  ;;  %v217_v6 = vld [vmem:[%s787_s18 + $0x20] sm:$0xff] }
  0x20   : > { %v417_v2 = vadd.f32 %v409_v54, %v393_v56  ;;  %v481_v4 = vmul.f32 0.24040814, %v813_v46  ;;  %v231_v7 = vld [vmem:[%s787_s18 + $0x9] sm:$0xff]  ;;  %v223_v9 = vmul.f32 0.078250125, %v215_v5  ;;  %v233_v11 = vld [vmem:[%s787_s18 + $0x21] sm:$0xff] }
  0x21   : > { %v419_v3 = vadd.f32 %v411_v55, %v395_v57  ;;  %v825_v8 = vadd.f32 %v431_v63, %v415_v62  ;;  %v225_v10 = vmul.f32 0.078250125, %v217_v6  ;;  %v255_v12 = vld [vmem:[%s787_s18 + $0xa] sm:$0xff]  ;;  %v239_v16 = vmul.f32 0.24040814, %v231_v7  ;;  %v257_v17 = vld [vmem:[%s787_s18 + $0x22] sm:$0xff] }
  0x22   : > { %v830_v13 = vadd.f32 %v433_v0, %v417_v2  ;;  %v489_v15 = vadd.f32 %v481_v4, %v464_v61  ;;  %v279_v18 = vld [vmem:[%s787_s18 + $0xb] sm:$0xff]  ;;  %v281_v19 = vld [vmem:[%s787_s18 + $0x23] sm:$0xff]  ;;  %v241_v21 = vmul.f32 0.24040814, %v233_v11  ;;  %v263_v22 = vmul.f32 0.36268348, %v255_v12 }
  0x23   : > { %v832_v14 = vadd.f32 %v435_v1, %v419_v3  ;;  %v505_v20 = vmul.f32 0.36268348, %v825_v8  ;;  %v247_v25 = vadd.f32 %v239_v16, %v223_v9  ;;  %v265_v26 = vmul.f32 0.36268348, %v257_v17  ;;  %v303_v31 = vld [vmem:[%s787_s18 + $0xc] sm:$0xff]  ;;  %v305_v32 = vld [vmem:[%s787_s18 + $0x24] sm:$0xff] }
  0x24   : > { %v839_v23 = vmul.f32 0.24040814, %v830_v13  ;;  %v249_v28 = vadd.f32 %v241_v21, %v225_v10  ;;  %v287_v29 = vmul.f32 0.24040814, %v279_v18  ;;  %v289_v30 = vmul.f32 0.24040814, %v281_v19 }
  0x25   : > { %v555_v24 = vmul.f32 0.078250125, %v832_v14  ;;  %v513_v27 = vadd.f32 %v505_v20, %v489_v15  ;;  %v271_v33 = vadd.f32 %v263_v22, %v247_v25  ;;  %v311_v34 = vmul.f32 0.078250125, %v303_v31  ;;  %v336_v36 = vld [vmem:[%s795_s21 + $0x8] sm:$0xff]  ;;  %v338_v37 = vld [vmem:[%s795_s21 + $0x20] sm:$0xff] }
  0x26   : > { %v313_v35 = vmul.f32 0.078250125, %v305_v32  ;;  %v273_v39 = vadd.f32 %v265_v26, %v249_v28  ;;  %v340_v40 = vld [vmem:[%s795_s21 + $0x38] sm:$0xff]  ;;  %v344_v41 = vmul.f32 0.078250125, %v336_v36  ;;  %v352_v43 = vld [vmem:[%s795_s21 + $0x9] sm:$0xff] }
  0x27   : > { %v538_v38 = vadd.f32 %v513_v27, %v839_v23  ;;  %v346_v42 = vmul.f32 0.078250125, %v338_v37  ;;  %v295_v44 = vadd.f32 %v287_v29, %v271_v33  ;;  %v348_v45 = vmul.f32 0.078250125, %v340_v40  ;;  %v354_v47 = vld [vmem:[%s795_s21 + $0x21] sm:$0xff]  ;;  %v356_v48 = vld [vmem:[%s795_s21 + $0x39] sm:$0xff] }
  0x28   : > { %v360_v49 = vmul.f32 0.24040814, %v352_v43  ;;  %v297_v51 = vadd.f32 %v289_v30, %v273_v39  ;;  %v362_v52 = vmul.f32 0.24040814, %v354_v47  ;;  %v364_v53 = vmul.f32 0.24040814, %v356_v48 }
  0x29   : > { %v563_v50 = vadd.f32 %v555_v24, %v538_v38  ;;  %v376_v54 = vld [vmem:[%s795_s21 + $0xa] sm:$0xff]  ;;  %v378_v55 = vld [vmem:[%s795_s21 + $0x22] sm:$0xff]  ;;  %v319_v56 = vadd.f32 %v311_v34, %v295_v44  ;;  %v380_v58 = vld [vmem:[%s795_s21 + $0x3a] sm:$0xff]  ;;  %v466_v28 = vmul.f32 0.078250125, %v813_v46 }
  0x2a   : > { %v368_v57 = vadd.f32 %v360_v49, %v344_v41  ;;  %v384_v59 = vmul.f32 0.36268348, %v376_v54  ;;  %v386_v60 = vmul.f32 0.36268348, %v378_v55  ;;  %v400_v61 = vld [vmem:[%s795_s21 + $0xb] sm:$0xff]  ;;  %v863_v62 = vadd.f32 %v313_v35, %v297_v51  ;;  %v402_v2 = vld [vmem:[%s795_s21 + $0x23] sm:$0xff] }
  0x2b   : > { %571 = vst [vmem:[%s854_s25] sm:$0xff] %v563_v50  ;;  %v370_v63 = vadd.f32 %v362_v52, %v346_v42  ;;  %v372_v0 = vadd.f32 %v364_v53, %v348_v45  ;;  %v388_v1 = vmul.f32 0.36268348, %v380_v58  ;;  %v404_v3 = vld [vmem:[%s795_s21 + $0x3b] sm:$0xff]  ;;  %v424_v4 = vld [vmem:[%s795_s21 + $0xc] sm:$0xff]  ;;  %v408_v6 = vmul.f32 0.24040814, %v400_v61 }
  0x2c   : > { %v392_v5 = vadd.f32 %v384_v59, %v368_v57  ;;  %v410_v7 = vmul.f32 0.24040814, %v402_v2  ;;  %v412_v9 = vmul.f32 0.24040814, %v404_v3  ;;  %v426_v12 = vld [vmem:[%s795_s21 + $0x24] sm:$0xff]  ;;  %v428_v15 = vld [vmem:[%s795_s21 + $0x3c] sm:$0xff] }
  0x2d   : > { %v394_v10 = vadd.f32 %v386_v60, %v370_v63  ;;  %v396_v11 = vadd.f32 %v388_v1, %v372_v0  ;;  %v432_v16 = vmul.f32 0.078250125, %v424_v4  ;;  %v465_v17 = vmul.f32 0.078250125, %v319_v56  ;;  %v341_v25 = vld [vmem:[%s795_s21 + $0x48] sm:$0xff]  ;;  %v342_v39 = vld [vmem:[%s795_s21 + $0x50] sm:$0xff] }
  0x2e   : > { %v416_v18 = vadd.f32 %v408_v6, %v392_v5  ;;  %v434_v19 = vmul.f32 0.078250125, %v426_v12  ;;  %v436_v20 = vmul.f32 0.078250125, %v428_v15  ;;  %v482_v21 = vmul.f32 0.24040814, %v863_v62 }
  0x2f   : > { %v418_v22 = vadd.f32 %v410_v7, %v394_v10  ;;  %v420_v24 = vadd.f32 %v412_v9, %v396_v11  ;;  %v357_v26 = vld [vmem:[%s795_s21 + $0x49] sm:$0xff]  ;;  %v349_v31 = vmul.f32 0.078250125, %v341_v25  ;;  %v358_v40 = vld [vmem:[%s795_s21 + $0x51] sm:$0xff]  ;;  %v483_v43 = vmul.f32 0.24040814, %v825_v8 }
  0x30   : > { %v381_v27 = vld [vmem:[%s795_s21 + $0x4a] sm:$0xff]  ;;  %v875_v29 = vadd.f32 %v432_v16, %v416_v18  ;;  %v490_v30 = vadd.f32 %v482_v21, %v465_v17  ;;  %v365_v32 = vmul.f32 0.24040814, %v357_v26  ;;  %v892_v47 = vmul.f32 0.24040814, %v832_v14  ;;  %v382_v52 = vld [vmem:[%s795_s21 + $0x52] sm:$0xff] }
  0x31   : > { %v405_v33 = vld [vmem:[%s795_s21 + $0x4b] sm:$0xff]  ;;  %v879_v35 = vadd.f32 %v434_v19, %v418_v22  ;;  %v881_v36 = vadd.f32 %v436_v20, %v420_v24  ;;  %v389_v37 = vmul.f32 0.36268348, %v381_v27  ;;  %v491_v50 = vadd.f32 %v483_v43, %v466_v28  ;;  %v406_v53 = vld [vmem:[%s795_s21 + $0x53] sm:$0xff] }
  0x32   : > { %v429_v34 = vld [vmem:[%s795_s21 + $0x4c] sm:$0xff]  ;;  %v413_v38 = vmul.f32 0.24040814, %v405_v33  ;;  %v506_v46 = vmul.f32 0.36268348, %v875_v29  ;;  %v373_v41 = vadd.f32 %v365_v32, %v349_v31  ;;  %v430_v54 = vld [vmem:[%s795_s21 + $0x54] sm:$0xff] }
  0x33   : > { %v437_v42 = vmul.f32 0.078250125, %v429_v34  ;;  %v888_v44 = vmul.f32 0.24040814, %v879_v35  ;;  %v556_v45 = vmul.f32 0.078250125, %v881_v36 }
  0x34   : > { %v514_v48 = vadd.f32 %v506_v46, %v490_v30  ;;  %v397_v49 = vadd.f32 %v389_v37, %v373_v41  ;;  %v507_v51 = vmul.f32 0.36268348, %v830_v13  ;;  %v350_v55 = vmul.f32 0.078250125, %v342_v39  ;;  %v218_v63 = vld [vmem:[%s787_s18 + $0x30] sm:$0xff]  ;;  %v235_v27 = vld [vmem:[%s787_s18 + $0x39] sm:$0xff] }
  0x35   : > { %v366_v56 = vmul.f32 0.24040814, %v358_v40  ;;  %v390_v57 = vmul.f32 0.36268348, %v382_v52  ;;  %v414_v61 = vmul.f32 0.24040814, %v406_v53 }
  0x36   : > { %v539_v58 = vadd.f32 %v514_v48, %v888_v44  ;;  %v421_v59 = vadd.f32 %v413_v38, %v397_v49  ;;  %v515_v60 = vadd.f32 %v507_v51, %v491_v50  ;;  %v234_v0 = vld [vmem:[%s787_s18 + $0x31] sm:$0xff]  ;;  %v438_v3 = vmul.f32 0.078250125, %v430_v54  ;;  %v259_v28 = vld [vmem:[%s787_s18 + $0x3a] sm:$0xff]  ;;  %v236_v48 = vld [vmem:[%s787_s18 + $0x49] sm:$0xff] }
  0x37   : > { %v258_v1 = vld [vmem:[%s787_s18 + $0x32] sm:$0xff]  ;;  %v374_v2 = vadd.f32 %v366_v56, %v350_v55  ;;  %v467_v4 = vmul.f32 0.078250125, %v863_v62  ;;  %v484_v5 = vmul.f32 0.24040814, %v875_v29  ;;  %v283_v34 = vld [vmem:[%s787_s18 + $0x3b] sm:$0xff] }
  0x38   : > { %v564_v6 = vadd.f32 %v556_v45, %v539_v58  ;;  %v904_v7 = vadd.f32 %v437_v42, %v421_v59  ;;  %v540_v9 = vadd.f32 %v515_v60, %v892_v47  ;;  %v908_v10 = vmul.f32 0.24040814, %v881_v36  ;;  %v282_v11 = vld [vmem:[%s787_s18 + $0x33] sm:$0xff]  ;;  %v307_v37 = vld [vmem:[%s787_s18 + $0x3c] sm:$0xff]  ;;  %v260_v55 = vld [vmem:[%s787_s18 + $0x4a] sm:$0xff] }
  0x39   : > { %v306_v12 = vld [vmem:[%s787_s18 + $0x34] sm:$0xff]  ;;  %v398_v15 = vadd.f32 %v390_v57, %v374_v2  ;;  %v492_v16 = vadd.f32 %v484_v5, %v467_v4  ;;  %v508_v17 = vmul.f32 0.36268348, %v879_v35  ;;  %v226_v18 = vmul.f32 0.078250125, %v218_v63  ;;  %v284_v56 = vld [vmem:[%s787_s18 + $0x4b] sm:$0xff] }
  0x3a   : > { %v219_v62 = vld [vmem:[%s787_s18 + $0x38] sm:$0xff]  ;;  %572 = vst [vmem:[%s854_s25 + $0x8] sm:$0xff] %v564_v6  ;;  %v557_v19 = vmul.f32 0.078250125, %v904_v7  ;;  %v242_v20 = vmul.f32 0.24040814, %v234_v0 }
  0x3b   : > { %v266_v21 = vmul.f32 0.36268348, %v258_v1  ;;  %v422_v22 = vadd.f32 %v414_v61, %v398_v15  ;;  %v516_v24 = vadd.f32 %v508_v17, %v492_v16  ;;  %v290_v25 = vmul.f32 0.24040814, %v282_v11  ;;  %v308_v57 = vld [vmem:[%s787_s18 + $0x4c] sm:$0xff] }
  0x3c   : > { %v314_v26 = vmul.f32 0.078250125, %v306_v12  ;;  %v565_v30 = vadd.f32 %v557_v19, %v540_v9  ;;  %v250_v31 = vadd.f32 %v242_v20, %v226_v18  ;;  %v468_v32 = vmul.f32 0.078250125, %v825_v8  ;;  %v220_v8 = vld [vmem:[%s787_s18 + $0x48] sm:$0xff]  ;;  %v221_v2 = vld [vmem:[%s787_s18 + $0x50] sm:$0xff] }
  0x3d   : > { %v509_v33 = vmul.f32 0.36268348, %v832_v14  ;;  %v446_v38 = vadd.f32 %v438_v3, %v422_v22  ;;  %v541_v39 = vadd.f32 %v516_v24, %v908_v10  ;;  %v534_v40 = vmul.f32 0.24040814, %v904_v7  ;;  %v237_v3 = vld [vmem:[%s787_s18 + $0x51] sm:$0xff] }
  0x3e   : > { %v227_v46 = vmul.f32 0.078250125, %v219_v62  ;;  %573 = vst [vmem:[%s854_s25 + $0x10] sm:$0xff] %v565_v30  ;;  %v274_v41 = vadd.f32 %v266_v21, %v250_v31  ;;  %v493_v42 = vadd.f32 %v839_v23, %v468_v32  ;;  %v243_v43 = vmul.f32 0.24040814, %v235_v27  ;;  %v261_v12 = vld [vmem:[%s787_s18 + $0x52] sm:$0xff] }
  0x3f   : > { %v267_v45 = vmul.f32 0.36268348, %v259_v28  ;;  %v558_v14 = vmul.f32 0.078250125, %v446_v38  ;;  %v291_v49 = vmul.f32 0.24040814, %v283_v34 }
  0x40   : > { %v315_v50 = vmul.f32 0.078250125, %v307_v37  ;;  %v298_v51 = vadd.f32 %v290_v25, %v274_v41  ;;  %v517_v52 = vadd.f32 %v509_v33, %v493_v42  ;;  %v251_v53 = vadd.f32 %v243_v43, %v227_v46  ;;  %v285_v15 = vld [vmem:[%s787_s18 + $0x53] sm:$0xff] }
  0x41   : > { %v469_v54 = vmul.f32 0.078250125, %v875_v29  ;;  %v566_v58 = vadd.f32 %v558_v14, %v541_v39  ;;  %v510_v23 = vmul.f32 0.36268348, %v881_v36  ;;  %v535_v59 = vmul.f32 0.24040814, %v446_v38 }
  0x42   : > { %v228_v60 = vmul.f32 0.078250125, %v220_v8  ;;  %v322_v61 = vadd.f32 %v314_v26, %v298_v51  ;;  %v542_v63 = vadd.f32 %v534_v40, %v517_v52  ;;  %v275_v0 = vadd.f32 %v267_v45, %v251_v53  ;;  %v309_v27 = vld [vmem:[%s787_s18 + $0x54] sm:$0xff] }
  0x43   : > { %v494_v1 = vadd.f32 %v888_v44, %v469_v54  ;;  %574 = vst [vmem:[%s854_s25 + $0x18] sm:$0xff] %v566_v58  ;;  %v244_v4 = vmul.f32 0.24040814, %v236_v48  ;;  %v268_v29 = vmul.f32 0.36268348, %v260_v55 }
  0x44   : > { %v292_v5 = vmul.f32 0.24040814, %v284_v56  ;;  %v559_v6 = vmul.f32 0.078250125, %v322_v61  ;;  %v299_v9 = vadd.f32 %v291_v49, %v275_v0  ;;  %v316_v36 = vmul.f32 0.078250125, %v308_v57 }
  0x45   : > { %v518_v11 = vadd.f32 %v510_v23, %v494_v1  ;;  %v252_v16 = vadd.f32 %v244_v4, %v228_v60  ;;  %v470_v17 = vmul.f32 0.078250125, %v830_v13  ;;  %v511_v18 = vmul.f32 0.36268348, %v904_v7 }
  0x46   : > { %v536_v44 = vmul.f32 0.24040814, %v322_v61  ;;  %v567_v62 = vadd.f32 %v559_v6, %v542_v63  ;;  %v323_v19 = vadd.f32 %v315_v50, %v299_v9  ;;  %v229_v21 = vmul.f32 0.078250125, %v221_v2 }
  0x47   : > { %v543_v20 = vadd.f32 %v535_v59, %v518_v11  ;;  %v276_v22 = vadd.f32 %v268_v29, %v252_v16  ;;  %v495_v24 = vadd.f32 %v892_v47, %v470_v17  ;;  %v245_v25 = vmul.f32 0.24040814, %v237_v3 }
  0x48   : > { %v269_v26 = vmul.f32 0.36268348, %v261_v12  ;;  %575 = vst [vmem:[%s854_s25 + $0x20] sm:$0xff] %v567_v62  ;;  %v560_v28 = vmul.f32 0.078250125, %v323_v19 }
  0x49   : > { %v293_v30 = vmul.f32 0.24040814, %v285_v15  ;;  %v300_v31 = vadd.f32 %v292_v5, %v276_v22  ;;  %v519_v32 = vadd.f32 %v511_v18, %v495_v24  ;;  %v253_v13 = vadd.f32 %v245_v25, %v229_v21 }
  0x4a   : > { %v471_v7 = vmul.f32 0.078250125, %v879_v35  ;;  %v568_v33 = vadd.f32 %v560_v28, %v543_v20  ;;  %v317_v34 = vmul.f32 0.078250125, %v309_v27  ;;  %v512_v37 = vmul.f32 0.36268348, %v446_v38 }
  0x4b   : > { %v537_v39 = vmul.f32 0.24040814, %v323_v19  ;;  %v324_v40 = vadd.f32 %v316_v36, %v300_v31  ;;  %v544_v47 = vadd.f32 %v536_v44, %v519_v32  ;;  %v277_v46 = vadd.f32 %v269_v26, %v253_v13 }
  0x4c   : > { %v496_v41 = vadd.f32 %v908_v10, %v471_v7  ;;  %576 = vst [vmem:[%s854_s25 + $0x28] sm:$0xff] %v568_v33 }
  0x4d   : > { %v561_v42 = vmul.f32 0.078250125, %v324_v40  ;;  %v301_v43 = vadd.f32 %v293_v30, %v277_v46 }
  0x4e   : > { %v520_v45 = vadd.f32 %v512_v37, %v496_v41 }
  0x4f   : > { %v569_v8 = vadd.f32 %v561_v42, %v544_v47  ;;  %v325_v48 = vadd.f32 %v317_v34, %v301_v43 }
  0x50   : > { %v545_v14 = vadd.f32 %v537_v39, %v520_v45 }
  0x51   : > { %577 = vst [vmem:[%s854_s25 + $0x30] sm:$0xff] %v569_v8  ;;  %v562_v35 = vmul.f32 0.078250125, %v325_v48 }
  0x53   : > { %v570_v49 = vadd.f32 %v562_v35, %v545_v14 }
  0x55   : > { %578 = vst [vmem:[%s854_s25 + $0x38] sm:$0xff] %v570_v49 }
  0x56 PF: > { %s12_s11 = sadd.s32 1, %s746_s11   ;;  %s961_s9 = smov %s742_s10 }
  0x57   : > { %p9_p6 = scmp.ge.s32.totalorder %s12_s11, 6   ;;  %s962_s10 = smov %s964_s12 }
  0x59   :  { %11 = sbr.rel (!%p9_p6) target bundleno = 2 (0x2), region = 66 }

</bundles_post_ra>
